<compile_context>
chip_gen: v6e
topology: v6e:2x2x1
jax: 0.10.0
libtpu: 0.0.40
codegen_flags: <defaults>
</compile_context>

<pallas_src>
import functools
import numpy as np

import jax
import jax.numpy as jnp
from jax import lax
from jax.experimental import pallas as pl
from jax.experimental.pallas import tpu as pltpu

EPS = 1e-5               # PyTorch LayerNorm default
BF16 = jnp.bfloat16


def _layer_norm(x, g, b):
    mu = jnp.mean(x, axis=-1, keepdims=True)
    var = jnp.mean((x - mu) ** 2, axis=-1, keepdims=True)
    return (x - mu) * lax.rsqrt(var + EPS) * g + b


_VMEM_CAP_CACHE = None


def _vmem_cap():
    """Physical per-core VMEM bytes (128 MiB on v5e/v6e, 64 MiB on v7x)."""
    global _VMEM_CAP_CACHE
    if _VMEM_CAP_CACHE is None:
        try:
            _VMEM_CAP_CACHE = int(pltpu.get_tpu_info().vmem_capacity_bytes)
        except Exception:
            _VMEM_CAP_CACHE = 128 << 20
    return _VMEM_CAP_CACHE


def _cp(semantics, est_bytes):
    """CompilerParams with a generation-aware VMEM budget."""
    cap = min(64 << 20, (_vmem_cap() * 3) // 4)   # ~48 MiB on v7x, 64 MiB else
    limit = int(min(max(int(est_bytes * 1.5) + (4 << 20), 16 << 20), cap))
    return pltpu.CompilerParams(dimension_semantics=semantics,
                                vmem_limit_bytes=limit)


# ---------------------------------------------------------------------------
# Kernel 1: input projection (Linear) + LayerNorm, row-tiled over (B*T, F)
# ---------------------------------------------------------------------------
def _inproj_ln_kernel(x_ref, w_ref, b_ref, g_ref, beta_ref, o_ref):
    x = x_ref[...].astype(BF16)                                     # (blk, F)
    y = jnp.dot(x, w_ref[...], preferred_element_type=jnp.float32) + b_ref[...]
    o_ref[...] = _layer_norm(y, g_ref[...], beta_ref[...])


def input_proj_layernorm(x2d, w_t, b, gamma, beta):
    n, f = x2d.shape
    d = w_t.shape[1]
    blk = n if n <= 1024 else 1024
    est = 2 * blk * f * 4 + 2 * blk * d * 4 + f * d * 2 + 4 * d * 4
    return pl.pallas_call(
        _inproj_ln_kernel,
        grid=(pl.cdiv(n, blk),),
        out_shape=jax.ShapeDtypeStruct((n, d), jnp.float32),
        in_specs=[pl.BlockSpec((blk, f), lambda i: (i, 0)),
                  pl.BlockSpec((f, d), lambda i: (0, 0)),
                  pl.BlockSpec((1, d), lambda i: (0, 0)),
                  pl.BlockSpec((1, d), lambda i: (0, 0)),
                  pl.BlockSpec((1, d), lambda i: (0, 0))],
        out_specs=pl.BlockSpec((blk, d), lambda i: (i, 0)),
        compiler_params=_cp(("parallel",), est),
    )(x2d, w_t, b, gamma, beta)


# ---------------------------------------------------------------------------
# Kernel 2: one post-norm TransformerEncoderLayer (MHA + relu FFN)
#           grid = (batch, query-row blocks); K/V cached in VMEM scratch and
#           computed only when the q block index is 0 (q axis = "arbitrary").
# ---------------------------------------------------------------------------
def _xfmr_layer_kernel(n_heads, xq_ref, xf_ref,
                       wq_ref, bq_ref, wk_ref, bk_ref, wv_ref, bv_ref,
                       wo_ref, bo_ref, g1_ref, b1_ref,
                       w1_ref, bf1_ref, w2_ref, bf2_ref, g2_ref, b2_ref,
                       o_ref, k_sc, v_sc):
    xq = xq_ref[0]                                   # (TQ, D) query rows, f32
    d = xq.shape[-1]
    dh = d // n_heads

    # K/V projections + head split: once per sequence, reused by all q blocks.
    @pl.when(pl.program_id(1) == 0)
    def _():
        xf_b = xf_ref[0].astype(BF16)                # (T, D) full sequence
        k = jnp.dot(xf_b, wk_ref[...], preferred_element_type=jnp.float32) + bk_ref[...]
        v = jnp.dot(xf_b, wv_ref[...], preferred_element_type=jnp.float32) + bv_ref[...]
        k_sc[...] = jnp.stack([k[:, h * dh:(h + 1) * dh] for h in range(n_heads)],
                              axis=0).astype(BF16)                   # (H, T, dh)
        v_sc[...] = jnp.stack([v[:, h * dh:(h + 1) * dh] for h in range(n_heads)],
                              axis=0).astype(BF16)                   # (H, T, dh)

    xq_b = xq.astype(BF16)
    # NOTE: 1/sqrt(dh) attention scale is folded into Wq/bq at parameter prep.
    q = jnp.dot(xq_b, wq_ref[...], preferred_element_type=jnp.float32) + bq_ref[...]
    qh = jnp.stack([q[:, h * dh:(h + 1) * dh] for h in range(n_heads)],
                   axis=0).astype(BF16)                              # (H, TQ, dh)

    s = jnp.einsum('hqd,hkd->hqk', qh, k_sc[...],
                   preferred_element_type=jnp.float32)               # (H, TQ, T)
    p = jax.nn.softmax(s, axis=-1)                                   # f32 softmax
    ctx_h = jnp.einsum('hqk,hkd->hqd', p.astype(BF16), v_sc[...],
                       preferred_element_type=jnp.float32)           # (H, TQ, dh)
    ctx = jnp.concatenate([ctx_h[h] for h in range(n_heads)], axis=-1)

    attn = jnp.dot(ctx.astype(BF16), wo_ref[...],
                   preferred_element_type=jnp.float32) + bo_ref[...]
    x1 = _layer_norm(xq + attn, g1_ref[...], b1_ref[...])

    ff = jnp.maximum(
        jnp.dot(x1.astype(BF16), w1_ref[...],
                preferred_element_type=jnp.float32) + bf1_ref[...], 0.0)
    ff = jnp.dot(ff.astype(BF16), w2_ref[...],
                 preferred_element_type=jnp.float32) + bf2_ref[...]
    o_ref[0] = _layer_norm(x1 + ff, g2_ref[...], b2_ref[...])


def _pick_q_block(t, n_heads, vmem_cap):
    if t <= 128:
        return t
    max_tq = 512 if vmem_cap >= (96 << 20) else 256     # v5e/v6e vs v7x
    budget = vmem_cap // 4
    fallback = None
    for tq in (512, 256, 128, 64, 32):
        if tq > max_tq or t % tq != 0:
            continue
        fallback = tq
        # scores f32 + probs f32 + probs bf16 ~= 10 bytes per (h, q, k) elem
        if n_heads * tq * t * 10 <= budget:
            return tq
    return fallback if fallback is not None else t


def transformer_layer(x, lp, n_heads):
    b_, t, d = x.shape
    e = lp["w1_t"].shape[1]
    dh = d // n_heads
    tq = _pick_q_block(t, n_heads, _vmem_cap())
    nq = t // tq

    def wspec(shape):
        return pl.BlockSpec(shape, lambda b, q: (0,) * len(shape))

    est = (2 * t * d * 4                     # xf block (double-buffered) f32
           + 2 * t * d * 2                   # K/V bf16 scratch
           + 4 * tq * d * 4                  # xq + out, double-buffered
           + 2 * (4 * d * d + 2 * d * e)     # bf16 weights
           + n_heads * tq * t * 10           # scores f32 + probs f32 + probs bf16
           + tq * e * 6                      # FFN hidden f32 + bf16
           + 6 * tq * d * 4)                 # q/ctx/x1/ff temporaries
    return pl.pallas_call(
        functools.partial(_xfmr_layer_kernel, n_heads),
        grid=(b_, nq),
        out_shape=jax.ShapeDtypeStruct((b_, t, d), jnp.float32),
        in_specs=[
            pl.BlockSpec((1, tq, d), lambda b, q: (b, q, 0)),   # query rows
            pl.BlockSpec((1, t, d), lambda b, q: (b, 0, 0)),    # full seq (K/V)
            wspec((d, d)), wspec((1, d)),      # Wq, bq (pre-scaled)
            wspec((d, d)), wspec((1, d)),      # Wk, bk
            wspec((d, d)), wspec((1, d)),      # Wv, bv
            wspec((d, d)), wspec((1, d)),      # Wo, bo
            wspec((1, d)), wspec((1, d)),      # LN1 gamma/beta
            wspec((d, e)), wspec((1, e)),      # FFN W1, b1
            wspec((e, d)), wspec((1, d)),      # FFN W2, b2
            wspec((1, d)), wspec((1, d)),      # LN2 gamma/beta
        ],
        out_specs=pl.BlockSpec((1, tq, d), lambda b, q: (b, q, 0)),
        scratch_shapes=[pltpu.VMEM((n_heads, t, dh), BF16),
                        pltpu.VMEM((n_heads, t, dh), BF16)],
        compiler_params=_cp(("parallel", "arbitrary"), est),
    )(x, x,
      lp["wq_t"], lp["bq"], lp["wk_t"], lp["bk"], lp["wv_t"], lp["bv"],
      lp["wo_t"], lp["bo"], lp["g1"], lp["b1"],
      lp["w1_t"], lp["bf1"], lp["w2_t"], lp["bf2"], lp["g2"], lp["b2"])


# ---------------------------------------------------------------------------
# Kernel 3: EDA encoder LSTM -> final (h, c) only.
#   - time-chunked sequential grid; x@W_ih hoisted to one bf16 matmul/chunk
#   - four W_hh gate matrices fused into a single (D, 4D) matmul per step
#   - input streamed as bf16 (halves HBM->VMEM DMA), gates lane-sliced
# ---------------------------------------------------------------------------
def _lstm_enc_kernel(t_chunk, batch, x_ref, wih_ref, whh_ref, bias_ref,
                     h_out_ref, c_out_ref, h_sc, c_sc, gx_sc):
    k = pl.program_id(0)
    d = h_sc.shape[-1]

    @pl.when(k == 0)
    def _():
        h_sc[...] = jnp.zeros_like(h_sc)
        c_sc[...] = jnp.zeros_like(c_sc)

    # Hoisted input projection: one large MXU matmul per chunk instead of one
    # tiny matmul per recurrent step (input is time-major so each step below
    # reads one contiguous, aligned row block).
    gx_sc[...] = jnp.dot(x_ref[...], wih_ref[...],
                         preferred_element_type=jnp.float32)        # (tc*B, 4D)

    whh = whh_ref[...]                   # (D, 4D) bf16, all four gates fused
    bias = bias_ref[...]                 # (1, 4D) f32  (b_ih + b_hh)
    aligned = (batch % 8) == 0

    def step(t, carry):
        h, c = carry
        start = t * batch
        if aligned:
            start = pl.multiple_of(start, 8)
        g = (gx_sc[pl.ds(start, batch), :]
             + jnp.dot(h.astype(BF16), whh, preferred_element_type=jnp.float32)
             + bias)
        i_g = jax.nn.sigmoid(g[:, 0 * d:1 * d])
        f_g = jax.nn.sigmoid(g[:, 1 * d:2 * d])
        g_g = jnp.tanh(g[:, 2 * d:3 * d])
        o_g = jax.nn.sigmoid(g[:, 3 * d:4 * d])
        c_new = f_g * c + i_g * g_g
        h_new = o_g * jnp.tanh(c_new)
        return (h_new, c_new)

    h, c = lax.fori_loop(0, t_chunk, step, (h_sc[...], c_sc[...]), unroll=2)
    h_sc[...] = h
    c_sc[...] = c

    @pl.when(k == pl.num_programs(0) - 1)
    def _():
        h_out_ref[...] = h
        c_out_ref[...] = c


def _pick_time_chunk(t, batch, d, vmem_cap):
    if t <= 64:
        return t
    budget = vmem_cap // 4
    fallback = None
    for tc in (512, 256, 128, 64, 32, 16, 8):
        if t % tc != 0:
            continue
        fallback = tc
        # gate scratch (4D f32) + double-buffered bf16 input rows
        if tc * batch * d * 20 <= budget:
            return tc
    return fallback if fallback is not None else t


def lstm_encoder_final_state(x_flat_tm, batch, wih_t, whh_t, bias):
    tb, din = x_flat_tm.shape
    t = tb // batch
    d = whh_t.shape[0]
    tc = _pick_time_chunk(t, batch, d, _vmem_cap())
    nchunks = t // tc
    rows = tc * batch
    est = (2 * rows * din * 2 + rows * 4 * d * 4
           + (din * 4 * d + d * 4 * d) * 2 + 8 * batch * d * 4 + 4 * d * 4)
    h_n, c_n = pl.pallas_call(
        functools.partial(_lstm_enc_kernel, tc, batch),
        grid=(nchunks,),
        out_shape=(jax.ShapeDtypeStruct((batch, d), jnp.float32),
                   jax.ShapeDtypeStruct((batch, d), jnp.float32)),
        in_specs=[pl.BlockSpec((rows, din), lambda k: (k, 0)),
                  pl.BlockSpec((din, 4 * d), lambda k: (0, 0)),
                  pl.BlockSpec((d, 4 * d), lambda k: (0, 0)),
                  pl.BlockSpec((1, 4 * d), lambda k: (0, 0))],
        out_specs=(pl.BlockSpec((batch, d), lambda k: (0, 0)),
                   pl.BlockSpec((batch, d), lambda k: (0, 0))),
        scratch_shapes=[pltpu.VMEM((batch, d), jnp.float32),
                        pltpu.VMEM((batch, d), jnp.float32),
                        pltpu.VMEM((rows, 4 * d), jnp.float32)],
        compiler_params=_cp(("arbitrary",), est),
    )(x_flat_tm, wih_t, whh_t, bias)
    return h_n, c_n


# ---------------------------------------------------------------------------
# Kernel 4: fused EDA decoder LSTM (zero input) + counter Linear + BCE loss.
#   x == 0 so x@W_ih vanishes; the counter reads the attractors straight from
#   the VMEM-resident output (no extra launch / HBM round trip).
# ---------------------------------------------------------------------------
def _dec_counter_kernel(n_steps, batch, h0_ref, c0_ref, whh_ref, bias_ref,
                        wc_ref, bc_ref, lab_ref, att_ref, logit_ref, loss_ref):
    d = h0_ref.shape[-1]
    whh = whh_ref[...]                   # (D, 4D) bf16, fused gates
    bias = bias_ref[...]                 # (1, 4D)

    def step(s, carry):
        h, c = carry
        g = jnp.dot(h.astype(BF16), whh, preferred_element_type=jnp.float32) + bias
        i_g = jax.nn.sigmoid(g[:, 0 * d:1 * d])
        f_g = jax.nn.sigmoid(g[:, 1 * d:2 * d])
        g_g = jnp.tanh(g[:, 2 * d:3 * d])
        o_g = jax.nn.sigmoid(g[:, 3 * d:4 * d])
        c_new = f_g * c + i_g * g_g
        h_new = o_g * jnp.tanh(c_new)
        att_ref[pl.ds(s * batch, batch), :] = h_new   # rows ordered (step, b)
        return (h_new, c_new)

    lax.fori_loop(0, n_steps, step, (h0_ref[...], c0_ref[...]), unroll=2)

    # counter Linear + BCE-with-logits mean over all B*(max_n_spk+1) slots,
    # exactly like F.binary_cross_entropy_with_logits on the padded logits.
    a = att_ref[...]                                                 # (S1*B, D)
    x = jnp.dot(a, wc_ref[...], preferred_element_type=jnp.float32) + bc_ref[...]
    logit_ref[...] = x
    y = lab_ref[...]
    per = jnp.maximum(x, 0.0) - x * y + jnp.log(1.0 + jnp.exp(-jnp.abs(x)))
    loss_ref[0, 0] = jnp.mean(per)


def decoder_counter_loss(h0, c0, n_steps, whh_t, bias, wc, bc, labels_flat_tm):
    batch, d = h0.shape
    att, logit, loss = pl.pallas_call(
        functools.partial(_dec_counter_kernel, n_steps, batch),
        out_shape=(jax.ShapeDtypeStruct((n_steps * batch, d), jnp.float32),
                   jax.ShapeDtypeStruct((n_steps * batch, 1), jnp.float32),
                   jax.ShapeDtypeStruct((1, 1), jnp.float32)),
        in_specs=[pl.BlockSpec(memory_space=pltpu.MemorySpace.VMEM)] * 7,
        out_specs=(pl.BlockSpec(memory_space=pltpu.MemorySpace.VMEM),
                   pl.BlockSpec(memory_space=pltpu.MemorySpace.VMEM),
                   pl.BlockSpec(memory_space=pltpu.MemorySpace.SMEM)),
    )(h0, c0, whh_t, bias, wc, bc, labels_flat_tm)
    return att, logit, loss


# ---------------------------------------------------------------------------
# Kernel 5: ys = emb @ attractors^T, emitted lane-dense as (B, S, T)
# ---------------------------------------------------------------------------
def _ys_kernel(att_ref, emb_ref, o_ref):
    a = att_ref[0].astype(BF16)                                    # (S, D)
    e = emb_ref[0].astype(BF16)                                    # (T, D)
    o_ref[0] = lax.dot_general(a, e, (((1,), (1,)), ((), ())),
                               preferred_element_type=jnp.float32)  # (S, T)


def ys_matmul(att, emb):
    b_, s, d = att.shape
    t = emb.shape[1]
    est = 2 * s * d * 4 + 2 * t * d * 4 + 2 * s * t * 4
    return pl.pallas_call(
        _ys_kernel,
        grid=(b_,),
        out_shape=jax.ShapeDtypeStruct((b_, s, t), jnp.float32),
        in_specs=[pl.BlockSpec((1, s, d), lambda i: (i, 0, 0)),
                  pl.BlockSpec((1, t, d), lambda i: (i, 0, 0))],
        out_specs=pl.BlockSpec((1, s, t), lambda i: (i, 0, 0)),
        compiler_params=_cp(("parallel",), est),
    )(att, emb)


# ---------------------------------------------------------------------------
# Parameter init (deterministic, synthetic).  Matmul weights stored bf16;
# the 1/sqrt(d_head) attention scale is folded into Wq/bq here (do the same
# when importing PyTorch weights).
# ---------------------------------------------------------------------------
def init_params(key, in_size, n_units, e_units, n_heads, n_layers):
    keys = iter(jax.random.split(key, 256))

    def nrm(shape, scale=0.1, dtype=jnp.float32):
        return (scale * jax.random.normal(next(keys), shape, jnp.float32)).astype(dtype)

    dh = n_units // n_heads
    qscale = 1.0 / np.sqrt(dh)

    p = {"n_heads": n_heads}
    p["enc_w_t"] = nrm((in_size, n_units), dtype=BF16)
    p["enc_b"] = nrm((1, n_units))
    p["enc_ln_g"] = jnp.ones((1, n_units), jnp.float32)
    p["enc_ln_b"] = jnp.zeros((1, n_units), jnp.float32)

    layers = []
    for _ in range(n_layers):
        wq = nrm((n_units, n_units)) * qscale
        bq = nrm((1, n_units)) * qscale
        layers.append(dict(
            wq_t=wq.astype(BF16), bq=bq,
            wk_t=nrm((n_units, n_units), dtype=BF16), bk=nrm((1, n_units)),
            wv_t=nrm((n_units, n_units), dtype=BF16), bv=nrm((1, n_units)),
            wo_t=nrm((n_units, n_units), dtype=BF16), bo=nrm((1, n_units)),
            g1=jnp.ones((1, n_units), jnp.float32),
            b1=jnp.zeros((1, n_units), jnp.float32),
            w1_t=nrm((n_units, e_units), dtype=BF16), bf1=nrm((1, e_units)),
            w2_t=nrm((e_units, n_units), dtype=BF16), bf2=nrm((1, n_units)),
            g2=jnp.ones((1, n_units), jnp.float32),
            b2=jnp.zeros((1, n_units), jnp.float32),
        ))
    p["layers"] = layers

    # EDA LSTMs (PyTorch gate order i, f, g, o).  The four W_hh gate matrices
    # are fused into one (D, 4D) matrix; bias = b_ih + b_hh combined (1, 4D).
    # Decoder W_ih is omitted on purpose: the decoder input is all-zeros.
    p["eda_enc_wih_t"] = nrm((n_units, 4 * n_units), dtype=BF16)
    p["eda_enc_whh_t"] = nrm((n_units, 4 * n_units), dtype=BF16)
    p["eda_enc_b"] = nrm((1, 4 * n_units))
    p["eda_dec_whh_t"] = nrm((n_units, 4 * n_units), dtype=BF16)
    p["eda_dec_b"] = nrm((1, 4 * n_units))
    p["counter_w"] = nrm((n_units, 1))
    p["counter_b"] = nrm((1, 1))
    return p


# ---------------------------------------------------------------------------
# Full forward (eval mode, time_shuffle=False, dropout=identity)
# ---------------------------------------------------------------------------
def transformer_eda_forward(params, xs, ts, n_speakers=None):
    # TODO(synk): time_shuffle=True uses np.random.shuffle at runtime; only the
    #             deterministic time_shuffle=False branch is implemented.
    if n_speakers is None:
        n_speakers = [int(t.shape[1]) for t in ts]
    b_, t, f = xs.shape
    d = params["enc_w_t"].shape[1]

    # --- TransformerModel ---
    emb2d = input_proj_layernorm(xs.reshape(b_ * t, f), params["enc_w_t"],
                                 params["enc_b"], params["enc_ln_g"],
                                 params["enc_ln_b"])
    emb = emb2d.reshape(b_, t, d)
    for lp in params["layers"]:
        emb = transformer_layer(emb, lp, params["n_heads"])

    # --- EncoderDecoderAttractor ---
    # Encoder LSTM: only final (h, c) needed.  The time-major flattening is
    # fused with a bf16 downcast so the streamed operand is half the bytes.
    # TODO(synk): feeding batch-major blocks directly would also drop this op.
    emb_tm = jnp.transpose(emb, (1, 0, 2)).reshape(t * b_, d).astype(BF16)
    h_n, c_n = lstm_encoder_final_state(
        emb_tm, b_, params["eda_enc_wih_t"],
        params["eda_enc_whh_t"], params["eda_enc_b"])

    max_n_spk = max(n_speakers)
    s1 = max_n_spk + 1
    labels = np.asarray(
        [[1.0] * n + [0.0] * (1 + max_n_spk - n) for n in n_speakers],
        dtype=np.float32)
    # time-major flat labels to match the decoder's (step, batch) row order
    labels_tm = jnp.asarray(labels.T.reshape(s1 * b_, 1))

    att_flat, logit_flat, loss = decoder_counter_loss(
        h_n, c_n, s1, params["eda_dec_whh_t"], params["eda_dec_b"],
        params["counter_w"], params["counter_b"], labels_tm)
    attractors_full = jnp.transpose(att_flat.reshape(s1, b_, d), (1, 0, 2))
    logits = jnp.transpose(logit_flat.reshape(s1, b_))      # (B, S1)
    attractor_loss = loss[0, 0]

    # speaker-count prediction kept on-device (no forced host sync per call)
    probs = jax.nn.sigmoid(logits)
    below = probs < 0.5
    has_sil = jnp.any(below, axis=1)
    first_sil = jnp.argmax(below, axis=1).astype(jnp.int32)
    spk_predict = jnp.where(has_sil, first_sil, -1)
    n_speakers_predict = (
        spk_predict == jnp.asarray(n_speakers, jnp.int32)).astype(jnp.int32)

    # ys = emb @ attractors^T, computed lane-dense as (B, S, T) then transposed
    attractors = attractors_full[:, :-1, :]
    ys = jnp.transpose(ys_matmul(attractors, emb), (0, 2, 1))
    return ys, attractor_loss, n_speakers_predict, spk_predict


if __name__ == "__main__":
    in_size, n_units, e_units, n_heads, n_layers = 16, 32, 64, 4, 2
    B, T = 2, 8
    n_speakers = [2, 3]

    key = jax.random.PRNGKey(0)
    k_param, k_x = jax.random.split(key)
    params = init_params(k_param, in_size, n_units, e_units, n_heads, n_layers)
    xs = jax.random.normal(k_x, (B, T, in_size), jnp.float32)
    ts = jnp.zeros((B, T, max(n_speakers)), jnp.float32)  # unused when n_speakers given

    ys, attractor_loss, n_spk_correct, spk_predict = transformer_eda_forward(
        params, xs, ts, n_speakers=n_speakers)
    jax.block_until_ready((ys, attractor_loss, n_spk_correct, spk_predict))
    assert ys.shape == (B, T, max(n_speakers))
    print("KERNEL_OK")
</pallas_src>

<mosaic_0001>
module attributes {stable_mosaic.version = 11 : i64} {
  func.func @_inproj_ln_kernel(%arg0: i32, %arg1: memref<16x16xf32, #tpu.memory_space<vmem>>, %arg2: memref<16x32xbf16, #tpu.memory_space<vmem>>, %arg3: memref<1x32xf32, #tpu.memory_space<vmem>>, %arg4: memref<1x32xf32, #tpu.memory_space<vmem>>, %arg5: memref<1x32xf32, #tpu.memory_space<vmem>>, %arg6: memref<16x32xf32, #tpu.memory_space<vmem>>) attributes {dimension_semantics = [#tpu.dimension_semantics<parallel>], iteration_bounds = array<i64: 1>, scalar_prefetch = 0 : i64, scratch_operands = 0 : i64, tpu.core_type = #tpu.core_type<tc>, window_params = [{transform_indices = @transform_0, window_bounds = array<i64: 16, 16>}, {pipeline_mode = #tpu.pipeline_mode<synchronous>, transform_indices = @transform_1, window_bounds = array<i64: 16, 32>}, {pipeline_mode = #tpu.pipeline_mode<synchronous>, transform_indices = @transform_2, window_bounds = array<i64: 1, 32>}, {pipeline_mode = #tpu.pipeline_mode<synchronous>, transform_indices = @transform_3, window_bounds = array<i64: 1, 32>}, {pipeline_mode = #tpu.pipeline_mode<synchronous>, transform_indices = @transform_4, window_bounds = array<i64: 1, 32>}, {transform_indices = @transform_5, window_bounds = array<i64: 16, 32>}]} {
    %c0 = arith.constant 0 : index
    %c0_0 = arith.constant 0 : index
    %0 = vector.load %arg1[%c0, %c0_0] : memref<16x16xf32, #tpu.memory_space<vmem>>, vector<16x16xf32>
    %1 = arith.truncf %0 : vector<16x16xf32> to vector<16x16xbf16>
    %c0_1 = arith.constant 0 : index
    %c0_2 = arith.constant 0 : index
    %2 = vector.load %arg2[%c0_1, %c0_2] : memref<16x32xbf16, #tpu.memory_space<vmem>>, vector<16x32xbf16>
    %cst = arith.constant dense<0.000000e+00> : vector<16x32xf32>
    %3 = tpu.matmul %1, %2, %cst {dimension_numbers = #tpu.dot_dimension_numbers<[1], [0], [0], [1], [0, 0, 1, 1], [], []>} : vector<16x16xbf16>, vector<16x32xbf16>, vector<16x32xf32> -> vector<16x32xf32>
    %c0_3 = arith.constant 0 : index
    %c0_4 = arith.constant 0 : index
    %4 = vector.load %arg3[%c0_3, %c0_4] : memref<1x32xf32, #tpu.memory_space<vmem>>, vector<1x32xf32>
    %5 = vector.broadcast %4 : vector<1x32xf32> to vector<16x32xf32>
    %6 = arith.addf %3, %5 : vector<16x32xf32>
    %c0_5 = arith.constant 0 : index
    %c0_6 = arith.constant 0 : index
    %7 = vector.load %arg4[%c0_5, %c0_6] : memref<1x32xf32, #tpu.memory_space<vmem>>, vector<1x32xf32>
    %c0_7 = arith.constant 0 : index
    %c0_8 = arith.constant 0 : index
    %8 = vector.load %arg5[%c0_7, %c0_8] : memref<1x32xf32, #tpu.memory_space<vmem>>, vector<1x32xf32>
    %cst_9 = arith.constant dense<0.000000e+00> : vector<16xf32>
    %9 = vector.multi_reduction <add>, %6, %cst_9 [1] : vector<16x32xf32> to vector<16xf32>
    %10 = vector.shape_cast %9 : vector<16xf32> to vector<16x1xf32>
    %cst_10 = arith.constant 3.200000e+01 : f32
    %11 = vector.broadcast %cst_10 : f32 to vector<16x1xf32>
    %12 = arith.divf %10, %11 : vector<16x1xf32>
    %13 = vector.broadcast %12 : vector<16x1xf32> to vector<16x32xf32>
    %14 = arith.subf %6, %13 : vector<16x32xf32>
    %15 = arith.mulf %14, %14 : vector<16x32xf32>
    %cst_11 = arith.constant dense<0.000000e+00> : vector<16xf32>
    %16 = vector.multi_reduction <add>, %15, %cst_11 [1] : vector<16x32xf32> to vector<16xf32>
    %17 = vector.shape_cast %16 : vector<16xf32> to vector<16x1xf32>
    %cst_12 = arith.constant 3.200000e+01 : f32
    %18 = vector.broadcast %cst_12 : f32 to vector<16x1xf32>
    %19 = arith.divf %17, %18 : vector<16x1xf32>
    %20 = vector.broadcast %12 : vector<16x1xf32> to vector<16x32xf32>
    %21 = arith.subf %6, %20 : vector<16x32xf32>
    %cst_13 = arith.constant 9.99999974E-6 : f32
    %22 = vector.broadcast %cst_13 : f32 to vector<16x1xf32>
    %23 = arith.addf %19, %22 : vector<16x1xf32>
    %24 = math.rsqrt %23 : vector<16x1xf32>
    %25 = vector.broadcast %24 : vector<16x1xf32> to vector<16x32xf32>
    %26 = arith.mulf %21, %25 : vector<16x32xf32>
    %27 = vector.broadcast %7 : vector<1x32xf32> to vector<16x32xf32>
    %28 = arith.mulf %26, %27 : vector<16x32xf32>
    %29 = vector.broadcast %8 : vector<1x32xf32> to vector<16x32xf32>
    %30 = arith.addf %28, %29 : vector<16x32xf32>
    %c0_14 = arith.constant 0 : index
    %c0_15 = arith.constant 0 : index
    %31 = vector.load %arg6[%c0_14, %c0_15] : memref<16x32xf32, #tpu.memory_space<vmem>>, vector<16x32xf32>
    tpu.vector_store %arg6[%c0_14, %c0_15], %30 {strides = array<i32>} : memref<16x32xf32, #tpu.memory_space<vmem>>, vector<16x32xf32>,
    return
  }
  func.func @transform_0(%arg0: i32) -> (i32, i32) {
    %c0_i32 = arith.constant 0 : i32
    %c0_i32_0 = arith.constant 0 : i32
    return %arg0, %c0_i32 : i32, i32
  }
  func.func @transform_1(%arg0: i32) -> (i32, i32) {
    %c0_i32 = arith.constant 0 : i32
    %c0_i32_0 = arith.constant 0 : i32
    %c0_i32_1 = arith.constant 0 : i32
    return %c0_i32, %c0_i32_0 : i32, i32
  }
  func.func @transform_2(%arg0: i32) -> (i32, i32) {
    %c0_i32 = arith.constant 0 : i32
    %c0_i32_0 = arith.constant 0 : i32
    %c0_i32_1 = arith.constant 0 : i32
    return %c0_i32, %c0_i32_0 : i32, i32
  }
  func.func @transform_3(%arg0: i32) -> (i32, i32) {
    %c0_i32 = arith.constant 0 : i32
    %c0_i32_0 = arith.constant 0 : i32
    %c0_i32_1 = arith.constant 0 : i32
    return %c0_i32, %c0_i32_0 : i32, i32
  }
  func.func @transform_4(%arg0: i32) -> (i32, i32) {
    %c0_i32 = arith.constant 0 : i32
    %c0_i32_0 = arith.constant 0 : i32
    %c0_i32_1 = arith.constant 0 : i32
    return %c0_i32, %c0_i32_0 : i32, i32
  }
  func.func @transform_5(%arg0: i32) -> (i32, i32) {
    %c0_i32 = arith.constant 0 : i32
    %c0_i32_0 = arith.constant 0 : i32
    return %arg0, %c0_i32 : i32, i32
  }
}

</mosaic_0001>

<bundles_post_ra>
// kernel: tpu_custom_call.1
= control target key start
LH: loop header
LB: loop body
LE: loop exit
PB: predicated region body
PF: predicated region fallthrough
CT: control target
= control target key end

     0   :  { %10 = vsyncpa [#allocation3], 0  ;;  %s341_s0 = inlined_call_operand.hbm [shape: f32[16,16], index: 0, kind: input, shape index: {}]   ;;  %s342_s1 = inlined_call_operand.hbm [shape: bf16[16,32], index: 1, kind: input, shape index: {}]   ;;  %s343_s2 = inlined_call_operand.vmem [shape: f32[1,32], index: 2, kind: input, shape index: {}]   ;;  %s344_s3 = inlined_call_operand.vmem [shape: f32[1,32], index: 3, kind: input, shape index: {}]   ;;  %s345_s4 = inlined_call_operand.vmem [shape: f32[1,32], index: 4, kind: input, shape index: {}]   ;;  %s346_s5 = inlined_call_operand.hbm [shape: f32[16,32], index: 5, kind: output, shape index: {}]  }
   0x1   :  { %11 = vsyncpa [#allocation6], 0 }
   0x2   :  { %12 = vsyncpa [#allocation4], 0  ;;  %s272_s18 = smov [#allocation2]  }
   0x3   :  { %s18_s19 = sshll.u32 %s272_s18, 4  ;;  %s19_s19 = int_to_ptr.vmem [resolvable:$true] %s18_s19 }
   0x4   :  { %s214_s20 = scalar_lea.vmem %s19_s19, 256  ;;  %p219_p1 = scmp.lt.s32.totalorder %s19_s19, %s19_s19 }
   0x5   :  { %p215_p0 = scmp.ne.s32.totalorder %s19_s19, %s214_s20  ;;  %p220_p2 = scmp.lt.s32.totalorder %s214_s20, %s214_s20 }
   0x7   :  { %p221_p3 = por %p220_p2, %p219_p1 }
   0x9   :  { %p222_p4 = pnand %p221_p3, %p215_p0 }
   0xb   :  { %225 = shalt.err (!%p222_p4)
}
   0xc   :  { %s273_s21 = smov 128   ;;  %s274_s22 = smov 8  }
   0xd   :  { %24 = dma.hbm_to_vmem [thread:$0]  %s341_s0, 256, %s19_s19, [#allocation3], %s273_s21, %s273_s21, %s274_s22  }
   0xe   :  { %s275_s25 = smov [#allocation5]  }
   0xf   :  { %s30_s26 = sshll.u32 %s275_s25, 4  ;;  %s31_s26 = int_to_ptr.vmem [resolvable:$true] %s30_s26 }
  0x10   :  { %s234_s27 = scalar_lea.vmem %s31_s26, 128  ;;  %p239_p6 = scmp.lt.s32.totalorder %s31_s26, %s31_s26 }
  0x11   :  { %p235_p5 = scmp.ne.s32.totalorder %s31_s26, %s234_s27  ;;  %p240_p7 = scmp.lt.s32.totalorder %s234_s27, %s234_s27 }
  0x13   :  { %p241_p8 = por %p240_p7, %p239_p6 }
  0x15   :  { %p242_p9 = pnand %p241_p8, %p235_p5 }
  0x17   :  { %245 = shalt.err (!%p242_p9)
}
  0x18   :  { %s276_s28 = smov 64   ;;  %s277_s29 = smov 4  }
  0x19   :  { %36 = dma.hbm_to_vmem [thread:$0]  %s342_s1, 128, %s31_s26, [#allocation6], %s276_s28, %s276_s28, %s277_s29  }
  0x1a   :  { %266 = dma.done.wait [#allocation3], 256  }
  0x1b   :  { %267 = vsyncadd [#allocation3], 4294967040 }
  0x1c   :  { %268 = dma.done.wait [#allocation6], 128  }
  0x1d   :  { %269 = vsyncadd [#allocation6], 4294967168  ;;  %v278_v0 = vmov 0.0   ;;  %vm279_vm0 = vmmov 0   ;;  %v201_v1 = vld [vmem:[#allocation5] sm:$0xff]   ;;  %v50_v2 = vld [vmem:[#allocation2] sm:$0xff] }
  0x1e   :  { %186 = vmatprep.subr.bf16.mxu0 %v278_v0  ;;  %188 = vmatprep.mubr.msk.bf16.mxu0 %vm279_vm0, %v278_v0  ;;  %v51_v3 = vld [vmem:[#allocation2 + $0x8] sm:$0xff]  ;;  %vm68_vm1 = vcmask 130048   ;;  %v179_v5 = vld [vmem:[%s343_s2] ss:$0 sm:$0xff]  ;;  %vm115_vm2 = vcmask 261120   ;;  %s280_s10 = smov [#allocation7]  }
  0x1f   :  { %187 = vmatpush3.bf16.msra.mxu0 %v201_v1  ;;  %v52_v4 = vpack.c.bf16 %v51_v3, %v50_v2  ;;  %v182_v31 = vld [vmem:[%s344_s3] ss:$0 sm:$0xff]  ;;  %s166_s11 = sshll.u32 %s280_s10, 4  ;;  %s167_s11 = int_to_ptr.vmem [resolvable:$true] %s166_s11 }
  0x20   :  { %v183_v33 = vld [vmem:[%s345_s4] ss:$0 sm:$0xff]  ;;  %s246_s12 = scalar_lea.vmem %s167_s11, 256  ;;  %p251_p11 = scmp.lt.s32.totalorder %s167_s11, %s167_s11 }
  0x21   :  { %p247_p10 = scmp.ne.s32.totalorder %s167_s11, %s246_s12  ;;  %p252_p12 = scmp.lt.s32.totalorder %s246_s12, %s246_s12 }
  0x22   :  { %189 = vmatmul.mubr.msk.bf16.vlgmr.msra.gmra.mxu0 %vm68_vm1, %v52_v4 }
  0x23   :  { %p253_p13 = por %p252_p12, %p251_p11 }
  0x25   :  { %p254_p0 = pnand %p253_p13, %p247_p10 }
  0xe2   :  { %v106_v6 = vpop.f32.mrf.mxu0 }
  0xe3   :  { %v107_v7 = vadd.f32 %v179_v5, %v106_v6 }
  0xe4   :  { %v190_v8 = vpop.f32.mrf.mxu0 }
  0xe5   :  { %v116_v9 = vsel %vm115_vm2, %v107_v7, 0.0 }
  0xe6   :  { %117 = vadd.xlane.f32.xlu0 %v116_v9  ;;  %v109_v10 = vpop.f32.mrf.mxu0 }
  0xe7   :  { %v110_v11 = vadd.f32 %v179_v5, %v109_v10 }
  0xe8   :  { %v191_v12 = vpop.f32.mrf.mxu0 }
  0xe9   :  { %v119_v13 = vsel %vm115_vm2, %v110_v11, 0.0 }
  0xea   :  { %120 = vadd.xlane.f32.xlu0 %v119_v13 }
 0x16f   :  { %v118_v14 = vpop.xlane.xlu0 %117 }
 0x170   :  { %v123_v15 = vmul.f32 0.03125, %v118_v14 }
 0x172   :  { %v125_v16 = vsub.f32 %v107_v7, %v123_v15 }
 0x173   :  { %v121_v17 = vpop.xlane.xlu0 %120 }
 0x174   :  { %v124_v18 = vmul.f32 0.03125, %v121_v17  ;;  %v127_v19 = vmul.f32 %v125_v16, %v125_v16 }
 0x176   :  { %v126_v20 = vsub.f32 %v110_v11, %v124_v18  ;;  %v129_v21 = vsel %vm115_vm2, %v127_v19, 0.0 }
 0x177   :  { %130 = vadd.xlane.f32.xlu1 %v129_v21 }
 0x178   :  { %v128_v22 = vmul.f32 %v126_v20, %v126_v20 }
 0x17a   :  { %v132_v23 = vsel %vm115_vm2, %v128_v22, 0.0 }
 0x17b   :  { %133 = vadd.xlane.f32.xlu1 %v132_v23 }
 0x200   :  { %v131_v24 = vpop.xlane.xlu1 %130 }
 0x201   :  { %v135_v25 = vmul.f32 0.03125, %v131_v24 }
 0x203   :  { %v137_v26 = vadd.f32 1e-05, %v135_v25 }
 0x204   :  { %v134_v27 = vpop.xlane.xlu1 %133 }
 0x205   :  { %202 = vrsqrt.f32 %v137_v26  ;;  %v136_v28 = vmul.f32 0.03125, %v134_v27 }
 0x207   :  { %v138_v29 = vadd.f32 1e-05, %v136_v28 }
 0x209   :  { %204 = vrsqrt.f32 %v138_v29 }
 0x212   :  { %v203_v30 = vpop.eup %202 }
 0x213   :  { %v141_v32 = vmul.f32 %v203_v30, %v125_v16 }
 0x215   :  { %v149_v34 = vmul.f32 %v182_v31, %v141_v32 }
 0x216   :  { %v205_v35 = vpop.eup %204 }
 0x217   :  { %v142_v36 = vmul.f32 %v205_v35, %v126_v20  ;;  %v157_v37 = vadd.f32 %v183_v33, %v149_v34 }
 0x219   :  { %v150_v38 = vmul.f32 %v182_v31, %v142_v36  ;;  %159 = vst.msk [vmem:[#allocation7] sm:$0xff] %vm115_vm2, %v157_v37 }
 0x21b   :  { %v158_v39 = vadd.f32 %v183_v33, %v150_v38 }
 0x21d   :  { %160 = vst.msk [vmem:[#allocation7 + $0x8] sm:$0xff] %vm115_vm2, %v158_v39 }
 0x21e   :  { %257 = shalt.err (!%p254_p0)
}
 0x21f   :  { %172 = dma.vmem_to_hbm [thread:$0]  %s167_s11, 256, %s346_s5, [#allocation4], %s273_s21, %s273_s21, %s274_s22  }
 0x220   :  { %270 = dma.done.wait [#allocation4], 256  }
 0x221   :  { %271 = vsyncadd [#allocation4], 4294967040 }
 0x222   :  { %176 = vsyncpa [#allocation3], 1 }
 0x223   :  { %177 = vsyncpa [#allocation6], 1 }
 0x224   :  { %178 = vsyncpa [#allocation4], 1 }

</bundles_post_ra>
